<compile_context>
chip_gen: v6e
topology: v6e:2x2x1
jax: 0.10.0
libtpu: 0.0.40
codegen_flags: <defaults>
</compile_context>

<pallas_src>
import jax
import jax.numpy as jnp
from jax.experimental import pallas as pl
from jax.experimental.pallas import tpu as pltpu


def _pad_value(dtype):
    """Identity element for max (implicit MaxPool2d padding value)."""
    if jnp.issubdtype(dtype, jnp.floating):
        return jnp.array(-jnp.inf, dtype=dtype)
    return jnp.array(jnp.iinfo(dtype).min, dtype=dtype)


def _pool5(src, rowpad_ref, colpad_ref, H, W):
    """Stride-1 5x5 max pool, pad=2, implicit -inf borders ('same' output).

    src: (Ct, H, W) value.
    rowpad_ref: (Ct, H+4, W) VMEM scratch, rows 0:2 and H+2:H+4 already -inf.
    colpad_ref: (Ct, H, W+4) VMEM scratch, cols 0:2 and W+2:W+4 already -inf.
    Separable shift-and-max, statically unrolled (pure VPU maxima).  The
    center tap (offset 2) equals the value already in registers, so only the
    4 shifted taps per direction are read back from scratch.
    """
    # Rows (H / sublane axis).
    rowpad_ref[:, 2:2 + H, :] = src
    r = src
    for d in (0, 1, 3, 4):
        r = jnp.maximum(r, rowpad_ref[:, d:d + H, :])
    # Cols (W / lane axis).
    colpad_ref[:, :, 2:2 + W] = r
    out = r
    for d in (0, 1, 3, 4):
        out = jnp.maximum(out, colpad_ref[:, :, d:d + W])
    return out


def spp_kernel(x_ref, o_ref, rowpad_ref, colpad_ref):
    # x_ref block: (1, Ct, H, W); o_ref block: (1, 4, Ct, H, W).
    ct, hp, w = rowpad_ref.shape
    h = hp - 4
    dt = x_ref.dtype
    pad = _pad_value(dt)

    # Fill the borders once per step; pool interiors never touch them.
    neg_rows = jnp.full((ct, 2, w), pad, dtype=dt)
    rowpad_ref[:, 0:2, :] = neg_rows
    rowpad_ref[:, h + 2:h + 4, :] = neg_rows
    neg_cols = jnp.full((ct, h, 2), pad, dtype=dt)
    colpad_ref[:, :, 0:2] = neg_cols
    colpad_ref[:, :, w + 2:w + 4] = neg_cols

    x = x_ref[0]                                      # (Ct, H, W)
    p5 = _pool5(x, rowpad_ref, colpad_ref, h, w)      # 5x5
    p9 = _pool5(p5, rowpad_ref, colpad_ref, h, w)     # 5∘5 == 9x9 (exact)
    p13 = _pool5(p9, rowpad_ref, colpad_ref, h, w)    # 9∘5 == 13x13 (exact)

    # Channel ordering matches torch.cat([x, o1, o2, o3], dim=1).
    o_ref[0, 0] = x
    o_ref[0, 1] = p5
    o_ref[0, 2] = p9
    o_ref[0, 3] = p13


def _round_up(x, m):
    return (x + m - 1) // m * m


def _choose_channel_tile(C, H, W, itemsize, budget_bytes=28 * 1024 * 1024):
    """Largest divisor of C whose PADDED per-step VMEM footprint fits budget.

    Accounts for (8, 128) VMEM tile rounding of the last two dims, the
    double-buffered input block, the double-buffered 4x output block, and the
    two padded scratch buffers.
    """
    hp = _round_up(H, 8)
    wp = _round_up(W, 128)
    plane = hp * wp * itemsize
    rowpad = _round_up(H + 4, 8) * wp * itemsize
    colpad = hp * _round_up(W + 4, 128) * itemsize

    def footprint(ct):
        return ct * (2 * plane + 2 * 4 * plane + rowpad + colpad)

    best = 1
    for cand in range(1, C + 1):
        if C % cand == 0 and footprint(cand) <= budget_bytes:
            best = cand
    return best


def spp_forward(x, *, channel_tile=None):
    """x: (N, C, H, W) float -> (N, 4*C, H, W), channels = [x, p5, p9, p13]."""
    N, C, H, W = x.shape
    ct = channel_tile or _choose_channel_tile(C, H, W, x.dtype.itemsize)
    assert C % ct == 0

    out = pl.pallas_call(
        spp_kernel,
        out_shape=jax.ShapeDtypeStruct((N, 4, C, H, W), x.dtype),
        grid=(N, C // ct),
        in_specs=[pl.BlockSpec((1, ct, H, W), lambda n, c: (n, c, 0, 0))],
        out_specs=pl.BlockSpec((1, 4, ct, H, W),
                               lambda n, c: (n, 0, c, 0, 0)),
        scratch_shapes=[
            pltpu.VMEM((ct, H + 4, W), x.dtype),   # row-padded buffer
            pltpu.VMEM((ct, H, W + 4), x.dtype),   # col-padded buffer
        ],
        compiler_params=pltpu.CompilerParams(
            dimension_semantics=("parallel", "parallel"),
            vmem_limit_bytes=48 * 1024 * 1024,
        ),
    )(x)
    # (N, 4, C, H, W) -> (N, 4C, H, W): contiguous, metadata-only reshape.
    return out.reshape(N, 4 * C, H, W)


def _spp_reference(x):
    """Pure-JAX reference via lax.reduce_window (torch MaxPool2d semantics)."""
    def pool(v, k):
        p = k // 2
        return jax.lax.reduce_window(
            v, -jnp.inf, jax.lax.max,
            window_dimensions=(1, 1, k, k),
            window_strides=(1, 1, 1, 1),
            padding=((0, 0), (0, 0), (p, p), (p, p)))
    return jnp.concatenate([x, pool(x, 5), pool(x, 9), pool(x, 13)], axis=1)


if __name__ == "__main__":
    key = jax.random.PRNGKey(0)
    N, C, H, W = 2, 4, 16, 16
    x = jax.random.normal(key, (N, C, H, W), dtype=jnp.float32)

    out = jax.block_until_ready(spp_forward(x))
    assert out.shape == (N, 4 * C, H, W), out.shape

    ref = _spp_reference(x)
    assert jnp.allclose(out, ref, atol=1e-6, rtol=1e-6), "mismatch vs reference"

    print("KERNEL_OK")
</pallas_src>

<mosaic_0001>
module attributes {stable_mosaic.version = 11 : i64} {
  func.func @spp_kernel(%arg0: i32, %arg1: i32, %arg2: memref<1x4x16x16xf32, #tpu.memory_space<vmem>>, %arg3: memref<1x4x4x16x16xf32, #tpu.memory_space<vmem>>, %arg4: memref<4x20x16xf32, #tpu.memory_space<vmem>>, %arg5: memref<4x16x20xf32, #tpu.memory_space<vmem>>) attributes {dimension_semantics = [#tpu.dimension_semantics<parallel>, #tpu.dimension_semantics<parallel>], iteration_bounds = array<i64: 2, 1>, scalar_prefetch = 0 : i64, scratch_operands = 2 : i64, tpu.core_type = #tpu.core_type<tc>, window_params = [{transform_indices = @transform_0, window_bounds = array<i64: 1, 4, 16, 16>}, {transform_indices = @transform_1, window_bounds = array<i64: 1, 4, 4, 16, 16>}]} {
    %cst = arith.constant 0xFF800000 : f32
    %0 = vector.broadcast %cst : f32 to vector<4x2x16xf32>
    %c0 = arith.constant 0 : index
    %c0_0 = arith.constant 0 : index
    %c0_1 = arith.constant 0 : index
    %1 = vector.load %arg4[%c0, %c0_0, %c0_1] : memref<4x20x16xf32, #tpu.memory_space<vmem>>, vector<4x2x16xf32>
    tpu.vector_store %arg4[%c0, %c0_0, %c0_1], %0 {strides = array<i32>} : memref<4x20x16xf32, #tpu.memory_space<vmem>>, vector<4x2x16xf32>,
    %c0_2 = arith.constant 0 : index
    %c18 = arith.constant 18 : index
    %c0_3 = arith.constant 0 : index
    %2 = vector.load %arg4[%c0_2, %c18, %c0_3] : memref<4x20x16xf32, #tpu.memory_space<vmem>>, vector<4x2x16xf32>
    tpu.vector_store %arg4[%c0_2, %c18, %c0_3], %0 {strides = array<i32>} : memref<4x20x16xf32, #tpu.memory_space<vmem>>, vector<4x2x16xf32>,
    %cst_4 = arith.constant 0xFF800000 : f32
    %3 = vector.broadcast %cst_4 : f32 to vector<4x16x2xf32>
    %c0_5 = arith.constant 0 : index
    %c0_6 = arith.constant 0 : index
    %c0_7 = arith.constant 0 : index
    %4 = vector.load %arg5[%c0_5, %c0_6, %c0_7] : memref<4x16x20xf32, #tpu.memory_space<vmem>>, vector<4x16x2xf32>
    tpu.vector_store %arg5[%c0_5, %c0_6, %c0_7], %3 {strides = array<i32>} : memref<4x16x20xf32, #tpu.memory_space<vmem>>, vector<4x16x2xf32>,
    %c0_8 = arith.constant 0 : index
    %c0_9 = arith.constant 0 : index
    %c18_10 = arith.constant 18 : index
    %5 = vector.load %arg5[%c0_8, %c0_9, %c18_10] : memref<4x16x20xf32, #tpu.memory_space<vmem>>, vector<4x16x2xf32>
    tpu.vector_store %arg5[%c0_8, %c0_9, %c18_10], %3 {strides = array<i32>} : memref<4x16x20xf32, #tpu.memory_space<vmem>>, vector<4x16x2xf32>,
    %c0_11 = arith.constant 0 : index
    %c0_12 = arith.constant 0 : index
    %c0_13 = arith.constant 0 : index
    %c0_14 = arith.constant 0 : index
    %6 = vector.load %arg2[%c0_11, %c0_12, %c0_13, %c0_14] : memref<1x4x16x16xf32, #tpu.memory_space<vmem>>, vector<1x4x16x16xf32>
    %7 = vector.shape_cast %6 : vector<1x4x16x16xf32> to vector<4x16x16xf32>
    %c0_15 = arith.constant 0 : index
    %c2 = arith.constant 2 : index
    %c0_16 = arith.constant 0 : index
    %8 = vector.load %arg4[%c0_15, %c2, %c0_16] : memref<4x20x16xf32, #tpu.memory_space<vmem>>, vector<4x16x16xf32>
    tpu.vector_store %arg4[%c0_15, %c2, %c0_16], %7 {strides = array<i32>} : memref<4x20x16xf32, #tpu.memory_space<vmem>>, vector<4x16x16xf32>,
    %c0_17 = arith.constant 0 : index
    %c0_18 = arith.constant 0 : index
    %c0_19 = arith.constant 0 : index
    %9 = vector.load %arg4[%c0_17, %c0_18, %c0_19] : memref<4x20x16xf32, #tpu.memory_space<vmem>>, vector<4x16x16xf32>
    %10 = arith.maximumf %7, %9 : vector<4x16x16xf32>
    %c0_20 = arith.constant 0 : index
    %c1 = arith.constant 1 : index
    %c0_21 = arith.constant 0 : index
    %11 = vector.load %arg4[%c0_20, %c1, %c0_21] : memref<4x20x16xf32, #tpu.memory_space<vmem>>, vector<4x16x16xf32>
    %12 = arith.maximumf %10, %11 : vector<4x16x16xf32>
    %c0_22 = arith.constant 0 : index
    %c3 = arith.constant 3 : index
    %c0_23 = arith.constant 0 : index
    %13 = vector.load %arg4[%c0_22, %c3, %c0_23] : memref<4x20x16xf32, #tpu.memory_space<vmem>>, vector<4x16x16xf32>
    %14 = arith.maximumf %12, %13 : vector<4x16x16xf32>
    %c0_24 = arith.constant 0 : index
    %c4 = arith.constant 4 : index
    %c0_25 = arith.constant 0 : index
    %15 = vector.load %arg4[%c0_24, %c4, %c0_25] : memref<4x20x16xf32, #tpu.memory_space<vmem>>, vector<4x16x16xf32>
    %16 = arith.maximumf %14, %15 : vector<4x16x16xf32>
    %c0_26 = arith.constant 0 : index
    %c0_27 = arith.constant 0 : index
    %c2_28 = arith.constant 2 : index
    %17 = vector.load %arg5[%c0_26, %c0_27, %c2_28] : memref<4x16x20xf32, #tpu.memory_space<vmem>>, vector<4x16x16xf32>
    tpu.vector_store %arg5[%c0_26, %c0_27, %c2_28], %16 {strides = array<i32>} : memref<4x16x20xf32, #tpu.memory_space<vmem>>, vector<4x16x16xf32>,
    %c0_29 = arith.constant 0 : index
    %c0_30 = arith.constant 0 : index
    %c0_31 = arith.constant 0 : index
    %18 = vector.load %arg5[%c0_29, %c0_30, %c0_31] : memref<4x16x20xf32, #tpu.memory_space<vmem>>, vector<4x16x16xf32>
    %19 = arith.maximumf %16, %18 : vector<4x16x16xf32>
    %c0_32 = arith.constant 0 : index
    %c0_33 = arith.constant 0 : index
    %c1_34 = arith.constant 1 : index
    %20 = vector.load %arg5[%c0_32, %c0_33, %c1_34] : memref<4x16x20xf32, #tpu.memory_space<vmem>>, vector<4x16x16xf32>
    %21 = arith.maximumf %19, %20 : vector<4x16x16xf32>
    %c0_35 = arith.constant 0 : index
    %c0_36 = arith.constant 0 : index
    %c3_37 = arith.constant 3 : index
    %22 = vector.load %arg5[%c0_35, %c0_36, %c3_37] : memref<4x16x20xf32, #tpu.memory_space<vmem>>, vector<4x16x16xf32>
    %23 = arith.maximumf %21, %22 : vector<4x16x16xf32>
    %c0_38 = arith.constant 0 : index
    %c0_39 = arith.constant 0 : index
    %c4_40 = arith.constant 4 : index
    %24 = vector.load %arg5[%c0_38, %c0_39, %c4_40] : memref<4x16x20xf32, #tpu.memory_space<vmem>>, vector<4x16x16xf32>
    %25 = arith.maximumf %23, %24 : vector<4x16x16xf32>
    %c0_41 = arith.constant 0 : index
    %c2_42 = arith.constant 2 : index
    %c0_43 = arith.constant 0 : index
    %26 = vector.load %arg4[%c0_41, %c2_42, %c0_43] : memref<4x20x16xf32, #tpu.memory_space<vmem>>, vector<4x16x16xf32>
    tpu.vector_store %arg4[%c0_41, %c2_42, %c0_43], %25 {strides = array<i32>} : memref<4x20x16xf32, #tpu.memory_space<vmem>>, vector<4x16x16xf32>,
    %c0_44 = arith.constant 0 : index
    %c0_45 = arith.constant 0 : index
    %c0_46 = arith.constant 0 : index
    %27 = vector.load %arg4[%c0_44, %c0_45, %c0_46] : memref<4x20x16xf32, #tpu.memory_space<vmem>>, vector<4x16x16xf32>
    %28 = arith.maximumf %25, %27 : vector<4x16x16xf32>
    %c0_47 = arith.constant 0 : index
    %c1_48 = arith.constant 1 : index
    %c0_49 = arith.constant 0 : index
    %29 = vector.load %arg4[%c0_47, %c1_48, %c0_49] : memref<4x20x16xf32, #tpu.memory_space<vmem>>, vector<4x16x16xf32>
    %30 = arith.maximumf %28, %29 : vector<4x16x16xf32>
    %c0_50 = arith.constant 0 : index
    %c3_51 = arith.constant 3 : index
    %c0_52 = arith.constant 0 : index
    %31 = vector.load %arg4[%c0_50, %c3_51, %c0_52] : memref<4x20x16xf32, #tpu.memory_space<vmem>>, vector<4x16x16xf32>
    %32 = arith.maximumf %30, %31 : vector<4x16x16xf32>
    %c0_53 = arith.constant 0 : index
    %c4_54 = arith.constant 4 : index
    %c0_55 = arith.constant 0 : index
    %33 = vector.load %arg4[%c0_53, %c4_54, %c0_55] : memref<4x20x16xf32, #tpu.memory_space<vmem>>, vector<4x16x16xf32>
    %34 = arith.maximumf %32, %33 : vector<4x16x16xf32>
    %c0_56 = arith.constant 0 : index
    %c0_57 = arith.constant 0 : index
    %c2_58 = arith.constant 2 : index
    %35 = vector.load %arg5[%c0_56, %c0_57, %c2_58] : memref<4x16x20xf32, #tpu.memory_space<vmem>>, vector<4x16x16xf32>
    tpu.vector_store %arg5[%c0_56, %c0_57, %c2_58], %34 {strides = array<i32>} : memref<4x16x20xf32, #tpu.memory_space<vmem>>, vector<4x16x16xf32>,
    %c0_59 = arith.constant 0 : index
    %c0_60 = arith.constant 0 : index
    %c0_61 = arith.constant 0 : index
    %36 = vector.load %arg5[%c0_59, %c0_60, %c0_61] : memref<4x16x20xf32, #tpu.memory_space<vmem>>, vector<4x16x16xf32>
    %37 = arith.maximumf %34, %36 : vector<4x16x16xf32>
    %c0_62 = arith.constant 0 : index
    %c0_63 = arith.constant 0 : index
    %c1_64 = arith.constant 1 : index
    %38 = vector.load %arg5[%c0_62, %c0_63, %c1_64] : memref<4x16x20xf32, #tpu.memory_space<vmem>>, vector<4x16x16xf32>
    %39 = arith.maximumf %37, %38 : vector<4x16x16xf32>
    %c0_65 = arith.constant 0 : index
    %c0_66 = arith.constant 0 : index
    %c3_67 = arith.constant 3 : index
    %40 = vector.load %arg5[%c0_65, %c0_66, %c3_67] : memref<4x16x20xf32, #tpu.memory_space<vmem>>, vector<4x16x16xf32>
    %41 = arith.maximumf %39, %40 : vector<4x16x16xf32>
    %c0_68 = arith.constant 0 : index
    %c0_69 = arith.constant 0 : index
    %c4_70 = arith.constant 4 : index
    %42 = vector.load %arg5[%c0_68, %c0_69, %c4_70] : memref<4x16x20xf32, #tpu.memory_space<vmem>>, vector<4x16x16xf32>
    %43 = arith.maximumf %41, %42 : vector<4x16x16xf32>
    %c0_71 = arith.constant 0 : index
    %c2_72 = arith.constant 2 : index
    %c0_73 = arith.constant 0 : index
    %44 = vector.load %arg4[%c0_71, %c2_72, %c0_73] : memref<4x20x16xf32, #tpu.memory_space<vmem>>, vector<4x16x16xf32>
    tpu.vector_store %arg4[%c0_71, %c2_72, %c0_73], %43 {strides = array<i32>} : memref<4x20x16xf32, #tpu.memory_space<vmem>>, vector<4x16x16xf32>,
    %c0_74 = arith.constant 0 : index
    %c0_75 = arith.constant 0 : index
    %c0_76 = arith.constant 0 : index
    %45 = vector.load %arg4[%c0_74, %c0_75, %c0_76] : memref<4x20x16xf32, #tpu.memory_space<vmem>>, vector<4x16x16xf32>
    %46 = arith.maximumf %43, %45 : vector<4x16x16xf32>
    %c0_77 = arith.constant 0 : index
    %c1_78 = arith.constant 1 : index
    %c0_79 = arith.constant 0 : index
    %47 = vector.load %arg4[%c0_77, %c1_78, %c0_79] : memref<4x20x16xf32, #tpu.memory_space<vmem>>, vector<4x16x16xf32>
    %48 = arith.maximumf %46, %47 : vector<4x16x16xf32>
    %c0_80 = arith.constant 0 : index
    %c3_81 = arith.constant 3 : index
    %c0_82 = arith.constant 0 : index
    %49 = vector.load %arg4[%c0_80, %c3_81, %c0_82] : memref<4x20x16xf32, #tpu.memory_space<vmem>>, vector<4x16x16xf32>
    %50 = arith.maximumf %48, %49 : vector<4x16x16xf32>
    %c0_83 = arith.constant 0 : index
    %c4_84 = arith.constant 4 : index
    %c0_85 = arith.constant 0 : index
    %51 = vector.load %arg4[%c0_83, %c4_84, %c0_85] : memref<4x20x16xf32, #tpu.memory_space<vmem>>, vector<4x16x16xf32>
    %52 = arith.maximumf %50, %51 : vector<4x16x16xf32>
    %c0_86 = arith.constant 0 : index
    %c0_87 = arith.constant 0 : index
    %c2_88 = arith.constant 2 : index
    %53 = vector.load %arg5[%c0_86, %c0_87, %c2_88] : memref<4x16x20xf32, #tpu.memory_space<vmem>>, vector<4x16x16xf32>
    tpu.vector_store %arg5[%c0_86, %c0_87, %c2_88], %52 {strides = array<i32>} : memref<4x16x20xf32, #tpu.memory_space<vmem>>, vector<4x16x16xf32>,
    %c0_89 = arith.constant 0 : index
    %c0_90 = arith.constant 0 : index
    %c0_91 = arith.constant 0 : index
    %54 = vector.load %arg5[%c0_89, %c0_90, %c0_91] : memref<4x16x20xf32, #tpu.memory_space<vmem>>, vector<4x16x16xf32>
    %55 = arith.maximumf %52, %54 : vector<4x16x16xf32>
    %c0_92 = arith.constant 0 : index
    %c0_93 = arith.constant 0 : index
    %c1_94 = arith.constant 1 : index
    %56 = vector.load %arg5[%c0_92, %c0_93, %c1_94] : memref<4x16x20xf32, #tpu.memory_space<vmem>>, vector<4x16x16xf32>
    %57 = arith.maximumf %55, %56 : vector<4x16x16xf32>
    %c0_95 = arith.constant 0 : index
    %c0_96 = arith.constant 0 : index
    %c3_97 = arith.constant 3 : index
    %58 = vector.load %arg5[%c0_95, %c0_96, %c3_97] : memref<4x16x20xf32, #tpu.memory_space<vmem>>, vector<4x16x16xf32>
    %59 = arith.maximumf %57, %58 : vector<4x16x16xf32>
    %c0_98 = arith.constant 0 : index
    %c0_99 = arith.constant 0 : index
    %c4_100 = arith.constant 4 : index
    %60 = vector.load %arg5[%c0_98, %c0_99, %c4_100] : memref<4x16x20xf32, #tpu.memory_space<vmem>>, vector<4x16x16xf32>
    %61 = arith.maximumf %59, %60 : vector<4x16x16xf32>
    %c0_101 = arith.constant 0 : index
    %c0_102 = arith.constant 0 : index
    %c0_103 = arith.constant 0 : index
    %c0_104 = arith.constant 0 : index
    %c0_105 = arith.constant 0 : index
    %62 = vector.load %arg3[%c0_101, %c0_102, %c0_103, %c0_104, %c0_105] : memref<1x4x4x16x16xf32, #tpu.memory_space<vmem>>, vector<1x1x4x16x16xf32>
    %63 = vector.shape_cast %62 : vector<1x1x4x16x16xf32> to vector<4x16x16xf32>
    %64 = vector.shape_cast %7 : vector<4x16x16xf32> to vector<1x1x4x16x16xf32>
    tpu.vector_store %arg3[%c0_101, %c0_102, %c0_103, %c0_104, %c0_105], %64 {strides = array<i32>} : memref<1x4x4x16x16xf32, #tpu.memory_space<vmem>>, vector<1x1x4x16x16xf32>,
    %c0_106 = arith.constant 0 : index
    %c1_107 = arith.constant 1 : index
    %c0_108 = arith.constant 0 : index
    %c0_109 = arith.constant 0 : index
    %c0_110 = arith.constant 0 : index
    %65 = vector.load %arg3[%c0_106, %c1_107, %c0_108, %c0_109, %c0_110] : memref<1x4x4x16x16xf32, #tpu.memory_space<vmem>>, vector<1x1x4x16x16xf32>
    %66 = vector.shape_cast %65 : vector<1x1x4x16x16xf32> to vector<4x16x16xf32>
    %67 = vector.shape_cast %25 : vector<4x16x16xf32> to vector<1x1x4x16x16xf32>
    tpu.vector_store %arg3[%c0_106, %c1_107, %c0_108, %c0_109, %c0_110], %67 {strides = array<i32>} : memref<1x4x4x16x16xf32, #tpu.memory_space<vmem>>, vector<1x1x4x16x16xf32>,
    %c0_111 = arith.constant 0 : index
    %c2_112 = arith.constant 2 : index
    %c0_113 = arith.constant 0 : index
    %c0_114 = arith.constant 0 : index
    %c0_115 = arith.constant 0 : index
    %68 = vector.load %arg3[%c0_111, %c2_112, %c0_113, %c0_114, %c0_115] : memref<1x4x4x16x16xf32, #tpu.memory_space<vmem>>, vector<1x1x4x16x16xf32>
    %69 = vector.shape_cast %68 : vector<1x1x4x16x16xf32> to vector<4x16x16xf32>
    %70 = vector.shape_cast %43 : vector<4x16x16xf32> to vector<1x1x4x16x16xf32>
    tpu.vector_store %arg3[%c0_111, %c2_112, %c0_113, %c0_114, %c0_115], %70 {strides = array<i32>} : memref<1x4x4x16x16xf32, #tpu.memory_space<vmem>>, vector<1x1x4x16x16xf32>,
    %c0_116 = arith.constant 0 : index
    %c3_117 = arith.constant 3 : index
    %c0_118 = arith.constant 0 : index
    %c0_119 = arith.constant 0 : index
    %c0_120 = arith.constant 0 : index
    %71 = vector.load %arg3[%c0_116, %c3_117, %c0_118, %c0_119, %c0_120] : memref<1x4x4x16x16xf32, #tpu.memory_space<vmem>>, vector<1x1x4x16x16xf32>
    %72 = vector.shape_cast %71 : vector<1x1x4x16x16xf32> to vector<4x16x16xf32>
    %73 = vector.shape_cast %61 : vector<4x16x16xf32> to vector<1x1x4x16x16xf32>
    tpu.vector_store %arg3[%c0_116, %c3_117, %c0_118, %c0_119, %c0_120], %73 {strides = array<i32>} : memref<1x4x4x16x16xf32, #tpu.memory_space<vmem>>, vector<1x1x4x16x16xf32>,
    return
  }
  func.func @transform_0(%arg0: i32, %arg1: i32) -> (i32, i32, i32, i32) {
    %c0_i32 = arith.constant 0 : i32
    %c0_i32_0 = arith.constant 0 : i32
    %c0_i32_1 = arith.constant 0 : i32
    return %arg0, %arg1, %c0_i32, %c0_i32_0 : i32, i32, i32, i32
  }
  func.func @transform_1(%arg0: i32, %arg1: i32) -> (i32, i32, i32, i32, i32) {
    %c0_i32 = arith.constant 0 : i32
    %c0_i32_0 = arith.constant 0 : i32
    %c0_i32_1 = arith.constant 0 : i32
    %c0_i32_2 = arith.constant 0 : i32
    return %arg0, %c0_i32, %arg1, %c0_i32_0, %c0_i32_1 : i32, i32, i32, i32, i32
  }
}

</mosaic_0001>

<bundles_post_ra>
// kernel: tpu_custom_call.1
= control target key start
LH: loop header
LB: loop body
LE: loop exit
PB: predicated region body
PF: predicated region fallthrough
CT: control target
= control target key end

     0   :  { %6 = vsyncpa [#allocation5], 0  ;;  %s1813_s0 = inlined_call_operand.hbm [shape: f32[2,4,16,16], index: 0, kind: input, shape index: {}]   ;;  %s1814_s1 = inlined_call_operand.hbm [shape: f32[2,4,4,16,16], index: 1, kind: output, shape index: {}]  }
   0x1   :  { %8 = vsyncpa [#allocation5 + $0x1], 0 }
   0x2   :  { %9 = vsyncpa [#allocation6], 0 }
   0x3   :  { %11 = vsyncpa [#allocation6 + $0x1], 0  ;;  %s1271_s6 = smov 0   ;;  %s1273_s7 = smov 0  }
   0x4   :  { %s1275_s8 = smov 0   ;;  %s1277_s9 = smov 0  }
   0x5   :  { %s1279_s10 = smov 0   ;;  %s1281_s11 = smov 0  }
   0x6 LB: > { %s1028_s12 = sadd.s32 4294967295, %s1248_s11   ;;  %s1029_s13 = sadd.s32 4294967294, %s1248_s11   ;;  %s1248_s11 = sphi %s1281_s11, %s17_s11   ;;  %s1244_s10 = sphi %s1279_s10, %s1825_s10   ;;  %s1240_s9 = sphi %s1277_s9, %s1824_s9   ;;  %s1236_s8 = sphi %s1275_s8, %s1823_s8   ;;  %s1232_s7 = sphi %s1273_s7, %s1822_s7   ;;  %s1228_s6 = sphi %s1271_s6, %s1821_s6  }
   0x7   : > { %s29_s14 = sadd.s32 1, %s1244_s10  ;;  %s38_s15 = sadd.s32 1, %s1236_s8 }
   0x8   : > { %p31_p0 = scmp.ge.s32.totalorder %s29_s14, 2  ;;  %p45_p1 = scmp.ne.s32.totalorder %s1236_s8, %s1232_s7 }
   0x9   : > { %p46_p2 = scmp.eq.s32.totalorder %s1248_s11, 0  ;;  %p51_p3 = scmp.ne.s32.totalorder %s1232_s7, %s1228_s6 }
   0xa   : > { %s1827_s14 = smov (%p31_p0, %s29_s14), 0  ;;  %p52_p5 = scmp.eq.s32.totalorder %s1028_s12, 0 }
   0xb   : > { %p1312_p4 = por %p46_p2, %p45_p1  ;;  %s33_s17 = ssub.s32 %s1244_s10, %s1827_s14 }
   0xc   : > { %p77_p6 = scmp.eq.s32.totalorder %s1028_s12, 1  ;;  %p36_p7 = scmp.eq.s32.totalorder %s33_s17, 0 }
   0xd   : > { %p1318_p8 = por %p52_p5, %p51_p3  ;;  %p83_p10 = scmp.eq.s32.totalorder %s1029_s13, 1 }
   0xe   : > { %p1322_p9 = por %p77_p6, %p45_p1  ;;  %p1081_p13 = scmp.lt.s32.totalorder %s1248_s11, 2 }
   0xf   : > { %s1327_s20 = scalar_select %p36_p7, %s1236_s8, %s38_s15  }
  0x10   : > { %p1329_p11 = por %p83_p10, %p51_p3  ;;  %s103_s22 = sand.u32 1, %s1236_s8  }
  0x11   : > { %s1032_s23 = sshll.u32 %s103_s22, 6  ;;  %s1067_s24 = sshll.u32 %s1244_s10, 10 }
  0x12   : > { %s116_s27 = scalar_lea.hbm %s1813_s0, %s1067_s24  ;;  %s107_s28 = scalar_lea.vmem [#allocation4], %s1032_s23 }
  0x13   : > { %s117_s29 = sshll.u32 %s107_s28, 4  ;;  %p1342_p0 = pnand %p1081_p13, %p1312_p4  ;;  %s118_s29 = int_to_ptr.vmem [resolvable:$true] %s117_s29 }
  0x14   : > { %p1035_p1 = scmp.ge.s32.totalorder %s1248_s11, 1  ;;  %s104_s2 = scalar_lea.sflag [#allocation5], %s103_s22 }
  0x15   : > { %p1142_p2 = pneg %p1342_p0  ;;  %s1153_s3 = scalar_lea.vmem %s118_s29, 1024 }
  0x16   : > { %p1154_p3 = scmp.ne.s32.totalorder %s118_s29, %s1153_s3  ;;  %s1250_s4 = smov [#allocation4]  }
  0x17   : > { %s1158_s5 = sshll.u32 %s1250_s4, 4  ;;  %s1159_s5 = int_to_ptr.vmem [resolvable:$false] %s1158_s5 }
  0x18   : > { %p1156_p5 = pnand %p1154_p3, %p1142_p2  ;;  %s1160_s12 = scalar_lea.vmem %s1159_s5, 2048 }
  0x19   : > { %p1161_p7 = scmp.lt.s32.totalorder %s118_s29, %s1159_s5  ;;  %p1162_p10 = scmp.lt.s32.totalorder %s1160_s12, %s1153_s3 }
  0x1a   : > { %p1157_p6 = pneg %p1156_p5 }
  0x1b   : > { %p1163_p12 = por %p1162_p10, %p1161_p7 }
  0x1d   : > { %p1164_p4 = pnand %p1163_p12, %p1157_p6 }
  0x1f   : > { %1167 = shalt.err (!%p1164_p4)
}
  0x20   : > { %s1251_s13 = smov 128   ;;  %s1252_s15 = smov 8  }
  0x21   : > { %1076 = dma.hbm_to_vmem [thread:$0]  (!%p1342_p0), %s116_s27, 1024, %s118_s29, %s104_s2, %s1251_s13, %s1251_s13, %s1252_s15  }
  0x22   : > { %p125_p13 = scmp.lt.s32.totalorder %s1248_s11, 3 }
  0x24   : > { %p126_p2 = pnand %p1035_p1, %p125_p13 }
  0x25   : > { %s1355_s16 = sand.u32 (!%p126_p2), 1, %s1232_s7  }
  0x26   : > { %129 = sbr.rel (%p126_p2) target bundleno = 951 (0x3b7), region = 24  ;;  %s1036_s17 = sshll.u32 (!%p126_p2), %s1355_s16, 6 }
  0x27   : > { %s132_s22 = scalar_lea.sflag (!%p126_p2), [#allocation5], %s1355_s16  ;;  %s1359_s23 = scalar_lea.vmem (!%p126_p2), [#allocation4], %s1036_s17 }
  0x2b   : > { %1219 = dma.done.wait (%p1318_p8), %s132_s22, 1024  }
  0x2c   : > { %1221 = vsyncadd (%p1318_p8), %s132_s22, 4294966272  ;;  %vm156_vm0 = vcmask 123904   ;;  %v1253_v0 = vmov -inf   ;;  %vm165_vm1 = vcmask 15360   ;;  %vm174_vm2 = vcmask 162960   ;;  %s1037_s18 = sshll.u32 %s1355_s16, 8 }
  0x2d   : > { %157 = vst.msk [vmem:[#allocation2] sm:$0x3] %vm156_vm0, %v1253_v0  ;;  %158 = vst.msk [vmem:[#allocation2 + $0x18] sm:$0x3] %vm156_vm0, %v1253_v0  ;;  %vm191_vm3 = vcmask 130048   ;;  %v183_v1 = vld [vmem:[%s1359_s23] sm:$0xff] }
  0x2e   : > { %159 = vst.msk [vmem:[#allocation2 + $0x30] sm:$0x3] %vm156_vm0, %v1253_v0  ;;  %160 = vst.msk [vmem:[#allocation2 + $0x48] sm:$0x3] %vm156_vm0, %v1253_v0  ;;  %v184_v2 = vld [vmem:[%s1359_s23 + $0x8] sm:$0xff]  ;;  %v185_v3 = vld [vmem:[%s1359_s23 + $0x10] sm:$0xff] }
  0x2f   : > { %161 = vst.msk [vmem:[#allocation2 + $0x12] sm:$0x3] %vm156_vm0, %v1253_v0  ;;  %162 = vst.msk [vmem:[#allocation2 + $0x2a] sm:$0x3] %vm156_vm0, %v1253_v0  ;;  %s1379_s24 = scalar_lea.vmem [#allocation7], %s1037_s18  ;;  %v186_v4 = vld [vmem:[%s1359_s23 + $0x18] sm:$0xff] }
  0x30   : > { %163 = vst.msk [vmem:[#allocation2 + $0x42] sm:$0x3] %vm156_vm0, %v1253_v0  ;;  %164 = vst.msk [vmem:[#allocation2 + $0x5a] sm:$0x3] %vm156_vm0, %v1253_v0  ;;  %v187_v5 = vld [vmem:[%s1359_s23 + $0x20] sm:$0xff]  ;;  %v188_v6 = vld [vmem:[%s1359_s23 + $0x28] sm:$0xff] }
  0x31   : > { %166 = vst.msk [vmem:[#allocation3] sm:$0xff] %vm165_vm1, %v1253_v0  ;;  %167 = vst.msk [vmem:[#allocation3 + $0x8] sm:$0xff] %vm165_vm1, %v1253_v0  ;;  %v1401_v7 = vld [vmem:[%s1359_s23 + $0x30] sm:$0xff]  ;;  %v1404_v8 = vld [vmem:[%s1359_s23 + $0x38] sm:$0xff]  ;;  %s1254_s25 = smov 2   ;;  %vm296_vm4 = vcmask 146448  }
  0x32   : > { %168 = vst.msk [vmem:[#allocation3 + $0x10] sm:$0xff] %vm165_vm1, %v1253_v0  ;;  %169 = vst.msk [vmem:[#allocation3 + $0x18] sm:$0xff] %vm165_vm1, %v1253_v0  ;;  %s1255_s26 = smov 127   ;;  %s1256_s27 = smov 125  }
  0x33   : > { %170 = vst.msk [vmem:[#allocation3 + $0x20] sm:$0xff] %vm165_vm1, %v1253_v0  ;;  %171 = vst.msk [vmem:[#allocation3 + $0x28] sm:$0xff] %vm165_vm1, %v1253_v0  ;;  %s1257_s28 = smov 124   ;;  %s1068_s29 = sshll.u32 %s1240_s9, 12 }
  0x34   : > { %172 = vst.msk [vmem:[#allocation3 + $0x30] sm:$0xff] %vm165_vm1, %v1253_v0  ;;  %173 = vst.msk [vmem:[#allocation3 + $0x38] sm:$0xff] %vm165_vm1, %v1253_v0  ;;  %s941_s30 = sshll.u32 %s1379_s24, 4  ;;  %s1761_s4 = scalar_lea.hbm %s1814_s1, %s1068_s29  ;;  %s1763_s30 = int_to_ptr.vmem [resolvable:$true] %s941_s30 }
  0x35   : > { %175 = vst.msk [vmem:[#allocation3] sm:$0xff] %vm174_vm2, %v1253_v0  ;;  %177 = vst.msk [vmem:[#allocation3 + $0x10] sm:$0xff] %vm174_vm2, %v1253_v0  ;;  %s925_s9 = scalar_lea.sflag [#allocation6], %s1355_s16  ;;  %s1168_s5 = scalar_lea.vmem %s1763_s30, 4096 }
  0x36   : > { %176 = vst.msk [vmem:[#allocation3 + $0x8] sm:$0xff] %vm174_vm2, %v1253_v0  ;;  %178 = vst.msk [vmem:[#allocation3 + $0x18] sm:$0xff] %vm174_vm2, %v1253_v0  ;;  %p1169_p8 = scmp.ne.s32.totalorder %s1763_s30, %s1168_s5  ;;  %s1258_s12 = smov [#allocation7]  }
  0x37   : > { %179 = vst.msk [vmem:[#allocation3 + $0x20] sm:$0xff] %vm174_vm2, %v1253_v0  ;;  %180 = vst.msk [vmem:[#allocation3 + $0x28] sm:$0xff] %vm174_vm2, %v1253_v0  ;;  %s1172_s13 = sshll.u32 %s1258_s12, 4  ;;  %s1173_s13 = int_to_ptr.vmem [resolvable:$false] %s1172_s13 }
  0x38   : > { %181 = vst.msk [vmem:[#allocation3 + $0x30] sm:$0xff] %vm174_vm2, %v1253_v0  ;;  %182 = vst.msk [vmem:[#allocation3 + $0x38] sm:$0xff] %vm174_vm2, %v1253_v0  ;;  %p1170_p12 = pnand %p1169_p8, %p1322_p9  ;;  %s1174_s15 = scalar_lea.vmem %s1173_s13, 8192 }
  0x39   : > { %192 = vst.msk [vmem:[#allocation2 + $0x2] sm:$0xff] %vm191_vm3, %v183_v1  ;;  %193 = vst.msk [vmem:[#allocation2 + $0xa] sm:$0xff] %vm191_vm3, %v184_v2  ;;  %p1175_p1 = scmp.lt.s32.totalorder %s1763_s30, %s1173_s13  ;;  %p1176_p3 = scmp.lt.s32.totalorder %s1174_s15, %s1168_s5 }
  0x3a   : > { %889 = vst.msk [vmem:[%s1379_s24] sm:$0xff] %vm191_vm3, %v183_v1  ;;  %890 = vst.msk [vmem:[%s1379_s24 + $0x8] sm:$0xff] %vm191_vm3, %v184_v2  ;;  %p1171_p0 = pneg %p1170_p12 }
  0x3b   : > { %194 = vst.msk [vmem:[#allocation2 + $0x1a] sm:$0xff] %vm191_vm3, %v185_v3  ;;  %891 = vst.msk [vmem:[%s1379_s24 + $0x10] sm:$0xff] %vm191_vm3, %v185_v3  ;;  %p1177_p5 = por %p1176_p3, %p1175_p1 }
  0x3c   : > { %195 = vst.msk [vmem:[#allocation2 + $0x22] sm:$0xff] %vm191_vm3, %v186_v4  ;;  %892 = vst.msk [vmem:[%s1379_s24 + $0x18] sm:$0xff] %vm191_vm3, %v186_v4 }
  0x3d   : > { %196 = vst.msk [vmem:[#allocation2 + $0x32] sm:$0xff] %vm191_vm3, %v187_v5  ;;  %197 = vst.msk [vmem:[#allocation2 + $0x3a] sm:$0xff] %vm191_vm3, %v188_v6  ;;  %p1178_p6 = pnand %p1177_p5, %p1171_p0 }
  0x3e   : > { %893 = vst.msk [vmem:[%s1379_s24 + $0x20] sm:$0xff] %vm191_vm3, %v187_v5  ;;  %894 = vst.msk [vmem:[%s1379_s24 + $0x28] sm:$0xff] %vm191_vm3, %v188_v6 }
  0x3f   : > { %198 = vst.msk [vmem:[#allocation2 + $0x4a] sm:$0xff] %vm191_vm3, %v1401_v7  ;;  %199 = vst.msk [vmem:[#allocation2 + $0x52] sm:$0xff] %vm191_vm3, %v1404_v8 }
  0x40   : > { %895 = vst.msk [vmem:[%s1379_s24 + $0x30] sm:$0xff] %vm191_vm3, %v1401_v7  ;;  %896 = vst.msk [vmem:[%s1379_s24 + $0x38] sm:$0xff] %vm191_vm3, %v1404_v8  ;;  %v200_v9 = vld [vmem:[#allocation2] sm:$0xff]  ;;  %v201_v16 = vld [vmem:[#allocation2 + $0x8] sm:$0xff] }
  0x41   : > { %v216_v10 = vld [vmem:[#allocation2 + $0x1] sm:$0xff]  ;;  %v208_v11 = vmax.f32 %v183_v1, %v200_v9  ;;  %v209_v20 = vmax.f32 %v184_v2, %v201_v16  ;;  %v217_v21 = vld [vmem:[#allocation2 + $0x9] sm:$0xff] }
  0x42   : > { %v202_v12 = vld [vmem:[#allocation2 + $0x18] sm:$0xff]  ;;  %v232_v14 = vld [vmem:[#allocation2 + $0x3] sm:$0xff]  ;;  %v233_v23 = vld [vmem:[#allocation2 + $0xb] sm:$0xff] }
  0x43   : > { %v218_v13 = vld [vmem:[#allocation2 + $0x19] sm:$0xff]  ;;  %v210_v15 = vmax.f32 %v185_v3, %v202_v12  ;;  %v224_v17 = vmax.f32 %v208_v11, %v216_v10  ;;  %v248_v18 = vld [vmem:[#allocation2 + $0x4] sm:$0xff]  ;;  %v225_v28 = vmax.f32 %v209_v20, %v217_v21  ;;  %v249_v33 = vld [vmem:[#allocation2 + $0xc] sm:$0xff] }
  0x44   : > { %v234_v19 = vld [vmem:[#allocation2 + $0x1b] sm:$0xff]  ;;  %v204_v30 = vld [vmem:[#allocation2 + $0x30] sm:$0xff]  ;;  %v235_v34 = vld [vmem:[#allocation2 + $0x23] sm:$0xff] }
  0x45   : > { %v226_v22 = vmax.f32 %v210_v15, %v218_v13  ;;  %v203_v24 = vld [vmem:[#allocation2 + $0x20] sm:$0xff]  ;;  %v240_v26 = vmax.f32 %v224_v17, %v232_v14  ;;  %v220_v31 = vld [vmem:[#allocation2 + $0x31] sm:$0xff]  ;;  %v212_v35 = vmax.f32 %v187_v5, %v204_v30  ;;  %v241_v38 = vmax.f32 %v225_v28, %v233_v23 }
  0x46   : > { %v219_v25 = vld [vmem:[#allocation2 + $0x21] sm:$0xff]  ;;  %v211_v29 = vmax.f32 %v186_v4, %v203_v24  ;;  %v205_v36 = vld [vmem:[#allocation2 + $0x38] sm:$0xff]  ;;  %v222_v48 = vld [vmem:[#allocation2 + $0x49] sm:$0xff] }
  0x47   : > { %v250_v27 = vld [vmem:[#allocation2 + $0x1c] sm:$0xff]  ;;  %v242_v32 = vmax.f32 %v226_v22, %v234_v19  ;;  %v1416_v37 = vmax.f32 %v240_v26, %v248_v18  ;;  %v251_v40 = vld [vmem:[#allocation2 + $0x24] sm:$0xff]  ;;  %v236_v41 = vld [vmem:[#allocation2 + $0x33] sm:$0xff]  ;;  %v213_v42 = vmax.f32 %v188_v6, %v205_v36  ;;  %v228_v45 = vmax.f32 %v212_v35, %v220_v31 }
  0x48   : > { %v227_v39 = vmax.f32 %v211_v29, %v219_v25  ;;  %v221_v43 = vld [vmem:[#allocation2 + $0x39] sm:$0xff]  ;;  %v206_v47 = vld [vmem:[#allocation2 + $0x48] sm:$0xff]  ;;  %v1422_v49 = vmax.f32 %v241_v38, %v249_v33  ;;  %v207_v53 = vld [vmem:[#allocation2 + $0x50] sm:$0xff] }
  0x49   : > { %v1418_v44 = vmax.f32 %v242_v32, %v250_v27  ;;  %v237_v46 = vld [vmem:[#allocation2 + $0x3b] sm:$0xff]  ;;  %272 = vrot.lane.b32.xlu0 %v1416_v37, %s1254_s25  ;;  %v229_v51 = vmax.f32 %v213_v42, %v221_v43  ;;  %v214_v52 = vmax.f32 %v1401_v7, %v206_v47  ;;  %v223_v54 = vld [vmem:[#allocation2 + $0x51] sm:$0xff]  ;;  %v244_v55 = vmax.f32 %v228_v45, %v236_v41 }
  0x4a   : > { %v243_v50 = vmax.f32 %v227_v39, %v235_v34  ;;  %v252_v56 = vld [vmem:[#allocation2 + $0x34] sm:$0xff]  ;;  %v238_v57 = vld [vmem:[#allocation2 + $0x4b] sm:$0xff]  ;;  %v215_v58 = vmax.f32 %v1404_v8, %v207_v53  ;;  %v253_v61 = vld [vmem:[#allocation2 + $0x3c] sm:$0xff] }
  0x4b   : > { %276 = vrot.lane.b32.xlu1 %v1418_v44, %s1254_s25  ;;  %v245_v60 = vmax.f32 %v229_v51, %v237_v46  ;;  %v230_v62 = vmax.f32 %v214_v52, %v222_v48  ;;  %v239_v63 = vld [vmem:[#allocation2 + $0x53] sm:$0xff]  ;;  %v1432_v1 = vmax.f32 %v244_v55, %v252_v56 }
  0x4c   : > { %v1428_v59 = vmax.f32 %v243_v50, %v251_v40  ;;  %v231_v0 = vmax.f32 %v215_v58, %v223_v54  ;;  %v254_v4 = vld [vmem:[#allocation2 + $0x4c] sm:$0xff]  ;;  %v255_v6 = vld [vmem:[#allocation2 + $0x54] sm:$0xff] }
  0x4d   : > { %274 = vrot.lane.b32.xlu0 %v1422_v49, %s1254_s25  ;;  %v246_v2 = vmax.f32 %v230_v62, %v238_v57  ;;  %v1436_v3 = vmax.f32 %v245_v60, %v253_v61 }
  0x4e   : > { %v247_v5 = vmax.f32 %v231_v0, %v239_v63 }
  0x4f   : > { %278 = vrot.lane.b32.xlu1 %v1428_v59, %s1254_s25  ;;  %v1440_v7 = vmax.f32 %v246_v2, %v254_v4 }
  0x50   : > { %v1444_v8 = vmax.f32 %v247_v5, %v255_v6 }
  0x51   : > { %280 = vrot.lane.b32.xlu0 %v1432_v1, %s1254_s25 }
  0x53   : > { %282 = vrot.lane.b32.xlu1 %v1436_v3, %s1254_s25 }
  0x55   : > { %284 = vrot.lane.b32.xlu0 %v1440_v7, %s1254_s25 }
  0x57   : > { %286 = vrot.lane.b32.xlu1 %v1444_v8, %s1254_s25 }
  0xbb   : > { %v273_v9 = vpop.permute.xlu0 %272 }
  0xbc   : > { %297 = vst.msk [vmem:[#allocation3] sm:$0xff] %vm296_vm4, %v273_v9 }
  0xbd   : > { %v277_v10 = vpop.permute.xlu1 %276 }
  0xbe   : > { %299 = vst.msk [vmem:[#allocation3 + $0x10] sm:$0xff] %vm296_vm4, %v277_v10 }
  0xbf   : > { %v275_v11 = vpop.permute.xlu0 %274 }
  0xc0   : > { %298 = vst.msk [vmem:[#allocation3 + $0x8] sm:$0xff] %vm296_vm4, %v275_v11 }
  0xc1   : > { %v279_v12 = vpop.permute.xlu1 %278 }
  0xc2   : > { %300 = vst.msk [vmem:[#allocation3 + $0x18] sm:$0xff] %vm296_vm4, %v279_v12 }
  0xc3   : > { %v281_v13 = vpop.permute.xlu0 %280  ;;  %v305_v14 = vld [vmem:[#allocation3] sm:$0xff] }
  0xc4   : > { %301 = vst.msk [vmem:[#allocation3 + $0x20] sm:$0xff] %vm296_vm4, %v281_v13  ;;  %329 = vrot.lane.b32.xlu0 %v305_v14, %s1255_s26  ;;  %v313_v39 = vmax.f32 %v1416_v37, %v305_v14 }
  0xc5   : > { %v283_v15 = vpop.permute.xlu1 %282  ;;  %v307_v16 = vld [vmem:[#allocation3 + $0x10] sm:$0xff] }
  0xc6   : > { %302 = vst.msk [vmem:[#allocation3 + $0x28] sm:$0xff] %vm296_vm4, %v283_v15  ;;  %v315_v45 = vmax.f32 %v1418_v44, %v307_v16 }
  0xc7   : > { %v285_v17 = vpop.permute.xlu0 %284  ;;  %v306_v18 = vld [vmem:[#allocation3 + $0x8] sm:$0xff] }
  0xc8   : > { %303 = vst.msk [vmem:[#allocation3 + $0x30] sm:$0xff] %vm296_vm4, %v285_v17  ;;  %333 = vrot.lane.b32.xlu0 %v307_v16, %s1255_s26  ;;  %331 = vrot.lane.b32.xlu1 %v306_v18, %s1255_s26  ;;  %v314_v43 = vmax.f32 %v1422_v49, %v306_v18 }
  0xc9   : > { %v287_v19 = vpop.permute.xlu1 %286  ;;  %v308_v20 = vld [vmem:[#allocation3 + $0x18] sm:$0xff] }
  0xca   : > { %304 = vst.msk [vmem:[#allocation3 + $0x38] sm:$0xff] %vm296_vm4, %v287_v19  ;;  %v316_v53 = vmax.f32 %v1428_v59, %v308_v20 }
  0xcb   : > { %v309_v21 = vld [vmem:[#allocation3 + $0x20] sm:$0xff] }
  0xcc   : > { %335 = vrot.lane.b32.xlu1 %v308_v20, %s1255_s26  ;;  %337 = vrot.lane.b32.xlu0 %v309_v21, %s1255_s26  ;;  %v317_v54 = vmax.f32 %v1432_v1, %v309_v21 }
  0xcd   : > { %v1463_v22 = vld [vmem:[#allocation3 + $0x28] sm:$0xff] }
  0xce   : > { %v318_v61 = vmax.f32 %v1436_v3, %v1463_v22 }
  0xcf   : > { %v1465_v23 = vld [vmem:[#allocation3 + $0x30] sm:$0xff] }
  0xd0   : > { %339 = vrot.lane.b32.xlu1 %v1463_v22, %s1255_s26  ;;  %341 = vrot.lane.b32.xlu0 %v1465_v23, %s1255_s26  ;;  %v319_v59 = vmax.f32 %v1440_v7, %v1465_v23 }
  0xd1   : > { %v1471_v24 = vld [vmem:[#allocation3 + $0x38] sm:$0xff] }
  0xd2   : > { %v320_v7 = vmax.f32 %v1444_v8, %v1471_v24 }
  0xd4   : > { %343 = vrot.lane.b32.xlu1 %v1471_v24, %s1255_s26  ;;  %361 = vrot.lane.b32.xlu0 %v305_v14, %s1256_s27 }
  0xd8   : > { %363 = vrot.lane.b32.xlu1 %v306_v18, %s1256_s27  ;;  %365 = vrot.lane.b32.xlu0 %v307_v16, %s1256_s27 }
  0xdc   : > { %367 = vrot.lane.b32.xlu1 %v308_v20, %s1256_s27  ;;  %369 = vrot.lane.b32.xlu0 %v309_v21, %s1256_s27 }
  0xe0   : > { %371 = vrot.lane.b32.xlu1 %v1463_v22, %s1256_s27  ;;  %373 = vrot.lane.b32.xlu0 %v1465_v23, %s1256_s27 }
  0xe4   : > { %375 = vrot.lane.b32.xlu1 %v1471_v24, %s1256_s27  ;;  %393 = vrot.lane.b32.xlu0 %v305_v14, %s1257_s28 }
  0xe8   : > { %395 = vrot.lane.b32.xlu1 %v306_v18, %s1257_s28  ;;  %397 = vrot.lane.b32.xlu0 %v307_v16, %s1257_s28 }
  0xec   : > { %399 = vrot.lane.b32.xlu1 %v308_v20, %s1257_s28  ;;  %401 = vrot.lane.b32.xlu0 %v309_v21, %s1257_s28 }
  0xf0   : > { %403 = vrot.lane.b32.xlu1 %v1463_v22, %s1257_s28  ;;  %405 = vrot.lane.b32.xlu0 %v1465_v23, %s1257_s28 }
  0xf4   : > { %407 = vrot.lane.b32.xlu1 %v1471_v24, %s1257_s28 }
 0x136   : > { %v330_v25 = vpop.permute.xlu0 %329 }
 0x137   : > { %v353_v42 = vmax.f32 %v313_v39, %v330_v25 }
 0x13a   : > { %v332_v26 = vpop.permute.xlu1 %331  ;;  %v334_v27 = vpop.permute.xlu0 %333 }
 0x13b   : > { %v354_v50 = vmax.f32 %v314_v43, %v332_v26  ;;  %v355_v51 = vmax.f32 %v315_v45, %v334_v27 }
 0x13e   : > { %v336_v28 = vpop.permute.xlu1 %335  ;;  %v338_v29 = vpop.permute.xlu0 %337 }
 0x13f   : > { %v356_v56 = vmax.f32 %v316_v53, %v336_v28  ;;  %v357_v57 = vmax.f32 %v317_v54, %v338_v29 }
 0x142   : > { %v340_v30 = vpop.permute.xlu1 %339  ;;  %v342_v31 = vpop.permute.xlu0 %341 }
 0x143   : > { %v358_v2 = vmax.f32 %v318_v61, %v340_v30  ;;  %v359_v4 = vmax.f32 %v319_v59, %v342_v31 }
 0x146   : > { %v344_v32 = vpop.permute.xlu1 %343  ;;  %v362_v33 = vpop.permute.xlu0 %361 }
 0x147   : > { %v385_v46 = vmax.f32 %v353_v42, %v362_v33  ;;  %v360_v15 = vmax.f32 %v320_v7, %v344_v32 }
 0x14a   : > { %v364_v34 = vpop.permute.xlu1 %363  ;;  %v366_v35 = vpop.permute.xlu0 %365 }
 0x14b   : > { %v386_v37 = vmax.f32 %v354_v50, %v364_v34  ;;  %v387_v55 = vmax.f32 %v355_v51, %v366_v35 }
 0x14e   : > { %v368_v36 = vpop.permute.xlu1 %367  ;;  %v370_v38 = vpop.permute.xlu0 %369 }
 0x14f   : > { %v388_v62 = vmax.f32 %v356_v56, %v368_v36  ;;  %v389_v63 = vmax.f32 %v357_v57, %v370_v38 }
 0x152   : > { %v372_v40 = vpop.permute.xlu1 %371  ;;  %v374_v41 = vpop.permute.xlu0 %373 }
 0x153   : > { %v390_v9 = vmax.f32 %v358_v2, %v372_v40  ;;  %v391_v10 = vmax.f32 %v359_v4, %v374_v41 }
 0x156   : > { %v1500_v47 = vpop.permute.xlu1 %375  ;;  %v394_v48 = vpop.permute.xlu0 %393 }
 0x157   : > { %v417_v52 = vmax.f32 %v385_v46, %v394_v48  ;;  %v392_v20 = vmax.f32 %v360_v15, %v1500_v47 }
 0x159   : > { %425 = vst.msk [vmem:[#allocation2 + $0x2] sm:$0xff] %vm191_vm3, %v417_v52  ;;  %1038 = vst.msk [vmem:[%s1379_s24 + $0x40] sm:$0xff] %vm191_vm3, %v417_v52 }
 0x15a   : > { %v396_v44 = vpop.permute.xlu1 %395  ;;  %v398_v49 = vpop.permute.xlu0 %397 }
 0x15b   : > { %v418_v58 = vmax.f32 %v386_v37, %v396_v44  ;;  %v419_v60 = vmax.f32 %v387_v55, %v398_v49 }
 0x15d   : > { %426 = vst.msk [vmem:[#allocation2 + $0xa] sm:$0xff] %vm191_vm3, %v418_v58  ;;  %1039 = vst.msk [vmem:[%s1379_s24 + $0x48] sm:$0xff] %vm191_vm3, %v418_v58 }
 0x15e   : > { %427 = vst.msk [vmem:[#allocation2 + $0x1a] sm:$0xff] %vm191_vm3, %v419_v60  ;;  %1040 = vst.msk [vmem:[%s1379_s24 + $0x50] sm:$0xff] %vm191_vm3, %v419_v60  ;;  %v400_v0 = vpop.permute.xlu1 %399  ;;  %v402_v1 = vpop.permute.xlu0 %401 }
 0x15f   : > { %v420_v3 = vmax.f32 %v388_v62, %v400_v0  ;;  %v421_v5 = vmax.f32 %v389_v63, %v402_v1 }
 0x160   : > { %v433_v6 = vld [vmem:[#allocation2] sm:$0xff] }
 0x161   : > { %v441_v11 = vmax.f32 %v417_v52, %v433_v6  ;;  %428 = vst.msk [vmem:[#allocation2 + $0x22] sm:$0xff] %vm191_vm3, %v420_v3  ;;  %1041 = vst.msk [vmem:[%s1379_s24 + $0x58] sm:$0xff] %vm191_vm3, %v420_v3  ;;  %v449_v12 = vld [vmem:[#allocation2 + $0x1] sm:$0xff] }
 0x162   : > { %429 = vst.msk [vmem:[#allocation2 + $0x32] sm:$0xff] %vm191_vm3, %v421_v5  ;;  %1042 = vst.msk [vmem:[%s1379_s24 + $0x60] sm:$0xff] %vm191_vm3, %v421_v5  ;;  %v404_v13 = vpop.permute.xlu1 %403  ;;  %v406_v14 = vpop.permute.xlu0 %405 }
 0x163   : > { %v457_v16 = vmax.f32 %v441_v11, %v449_v12  ;;  %v422_v17 = vmax.f32 %v390_v9, %v404_v13  ;;  %v423_v8 = vmax.f32 %v391_v10, %v406_v14 }
 0x164   : > { %v434_v18 = vld [vmem:[#allocation2 + $0x8] sm:$0xff] }
 0x165   : > { %v435_v19 = vld [vmem:[#allocation2 + $0x18] sm:$0xff]  ;;  %v442_v21 = vmax.f32 %v418_v58, %v434_v18  ;;  %430 = vst.msk [vmem:[#allocation2 + $0x3a] sm:$0xff] %vm191_vm3, %v422_v17  ;;  %1043 = vst.msk [vmem:[%s1379_s24 + $0x68] sm:$0xff] %vm191_vm3, %v422_v17  ;;  %v465_v23 = vld [vmem:[#allocation2 + $0x3] sm:$0xff] }
 0x166   : > { %v443_v22 = vmax.f32 %v419_v60, %v435_v19  ;;  %431 = vst.msk [vmem:[#allocation2 + $0x4a] sm:$0xff] %vm191_vm3, %v423_v8  ;;  %1044 = vst.msk [vmem:[%s1379_s24 + $0x70] sm:$0xff] %vm191_vm3, %v423_v8  ;;  %v450_v24 = vld [vmem:[#allocation2 + $0x9] sm:$0xff]  ;;  %v451_v25 = vld [vmem:[#allocation2 + $0x19] sm:$0xff]  ;;  %v408_v26 = vpop.permute.xlu1 %407  ;;  %v473_v27 = vmax.f32 %v457_v16, %v465_v23 }
 0x167   : > { %v458_v28 = vmax.f32 %v442_v21, %v450_v24  ;;  %v424_v30 = vmax.f32 %v392_v20, %v408_v26  ;;  %v481_v31 = vld [vmem:[#allocation2 + $0x4] sm:$0xff]  ;;  %v482_v43 = vld [vmem:[#allocation2 + $0xc] sm:$0xff] }
 0x168   : > { %v459_v29 = vmax.f32 %v443_v22, %v451_v25  ;;  %v436_v32 = vld [vmem:[#allocation2 + $0x20] sm:$0xff]  ;;  %v1532_v34 = vmax.f32 %v473_v27, %v481_v31  ;;  %v466_v35 = vld [vmem:[#allocation2 + $0xb] sm:$0xff] }
 0x169   : > { %v437_v33 = vld [vmem:[#allocation2 + $0x30] sm:$0xff]  ;;  %v444_v36 = vmax.f32 %v420_v3, %v436_v32  ;;  %432 = vst.msk [vmem:[#allocation2 + $0x52] sm:$0xff] %vm191_vm3, %v424_v30  ;;  %1045 = vst.msk [vmem:[%s1379_s24 + $0x78] sm:$0xff] %vm191_vm3, %v424_v30  ;;  %v474_v39 = vmax.f32 %v458_v28, %v466_v35  ;;  %v467_v40 = vld [vmem:[#allocation2 + $0x1b] sm:$0xff] }
 0x16a   : > { %v445_v38 = vmax.f32 %v421_v5, %v437_v33  ;;  %v452_v41 = vld [vmem:[#allocation2 + $0x21] sm:$0xff]  ;;  %v453_v42 = vld [vmem:[#allocation2 + $0x31] sm:$0xff]  ;;  %505 = vrot.lane.b32.xlu0 %v1532_v34, %s1254_s25  ;;  %v475_v45 = vmax.f32 %v459_v29, %v467_v40 }
 0x16b   : > { %v460_v46 = vmax.f32 %v444_v36, %v452_v41  ;;  %v1539_v48 = vmax.f32 %v474_v39, %v482_v43  ;;  %v483_v50 = vld [vmem:[#allocation2 + $0x1c] sm:$0xff]  ;;  %v484_v58 = vld [vmem:[#allocation2 + $0x24] sm:$0xff] }
 0x16c   : > { %v461_v47 = vmax.f32 %v445_v38, %v453_v42  ;;  %v438_v51 = vld [vmem:[#allocation2 + $0x38] sm:$0xff]  ;;  %v1541_v53 = vmax.f32 %v475_v45, %v483_v50  ;;  %v468_v54 = vld [vmem:[#allocation2 + $0x23] sm:$0xff] }
 0x16d   : > { %v439_v52 = vld [vmem:[#allocation2 + $0x48] sm:$0xff]  ;;  %v446_v37 = vmax.f32 %v422_v17, %v438_v51  ;;  %507 = vrot.lane.b32.xlu1 %v1539_v48, %s1254_s25  ;;  %v476_v44 = vmax.f32 %v460_v46, %v468_v54  ;;  %v469_v49 = vld [vmem:[#allocation2 + $0x33] sm:$0xff]  ;;  %v470_v2 = vld [vmem:[#allocation2 + $0x3b] sm:$0xff] }
 0x16e   : > { %v447_v55 = vmax.f32 %v423_v8, %v439_v52  ;;  %v454_v56 = vld [vmem:[#allocation2 + $0x39] sm:$0xff]  ;;  %v455_v57 = vld [vmem:[#allocation2 + $0x49] sm:$0xff]  ;;  %509 = vrot.lane.b32.xlu0 %v1541_v53, %s1254_s25  ;;  %v477_v60 = vmax.f32 %v461_v47, %v469_v49 }
 0x16f   : > { %v462_v61 = vmax.f32 %v446_v37, %v454_v56  ;;  %v1547_v62 = vmax.f32 %v476_v44, %v484_v58  ;;  %v485_v63 = vld [vmem:[#allocation2 + $0x34] sm:$0xff]  ;;  %v486_v9 = vld [vmem:[#allocation2 + $0x3c] sm:$0xff] }
 0x170   : > { %v463_v59 = vmax.f32 %v447_v55, %v455_v57  ;;  %v440_v0 = vld [vmem:[#allocation2 + $0x50] sm:$0xff]  ;;  %v1549_v1 = vmax.f32 %v477_v60, %v485_v63 }
 0x171   : > { %v471_v4 = vld [vmem:[#allocation2 + $0x4b] sm:$0xff]  ;;  %v448_v3 = vmax.f32 %v424_v30, %v440_v0  ;;  %511 = vrot.lane.b32.xlu1 %v1547_v62, %s1254_s25  ;;  %v478_v5 = vmax.f32 %v462_v61, %v470_v2  ;;  %v472_v14 = vld [vmem:[#allocation2 + $0x53] sm:$0xff] }
 0x172   : > { %v479_v6 = vmax.f32 %v463_v59, %v471_v4  ;;  %v456_v7 = vld [vmem:[#allocation2 + $0x51] sm:$0xff]  ;;  %513 = vrot.lane.b32.xlu0 %v1549_v1, %s1254_s25 }
 0x173   : > { %v487_v10 = vld [vmem:[#allocation2 + $0x4c] sm:$0xff]  ;;  %v464_v11 = vmax.f32 %v448_v3, %v456_v7  ;;  %v1555_v12 = vmax.f32 %v478_v5, %v486_v9  ;;  %v488_v16 = vld [vmem:[#allocation2 + $0x54] sm:$0xff] }
 0x174   : > { %v1557_v13 = vmax.f32 %v479_v6, %v487_v10 }
 0x175   : > { %515 = vrot.lane.b32.xlu1 %v1555_v12, %s1254_s25  ;;  %v480_v15 = vmax.f32 %v464_v11, %v472_v14 }
 0x176   : > { %517 = vrot.lane.b32.xlu0 %v1557_v13, %s1254_s25 }
 0x177   : > { %v1563_v17 = vmax.f32 %v480_v15, %v488_v16 }
 0x179   : > { %519 = vrot.lane.b32.xlu1 %v1563_v17, %s1254_s25 }
 0x1dc   : > { %v506_v8 = vpop.permute.xlu0 %505 }
 0x1dd   : > { %529 = vst.msk [vmem:[#allocation3] sm:$0xff] %vm296_vm4, %v506_v8 }
 0x1df   : > { %v508_v18 = vpop.permute.xlu1 %507 }
 0x1e0   : > { %530 = vst.msk [vmem:[#allocation3 + $0x8] sm:$0xff] %vm296_vm4, %v508_v18  ;;  %v510_v19 = vpop.permute.xlu0 %509 }
 0x1e1   : > { %531 = vst.msk [vmem:[#allocation3 + $0x10] sm:$0xff] %vm296_vm4, %v510_v19 }
 0x1e3   : > { %v512_v20 = vpop.permute.xlu1 %511 }
 0x1e4   : > { %532 = vst.msk [vmem:[#allocation3 + $0x18] sm:$0xff] %vm296_vm4, %v512_v20  ;;  %v514_v21 = vpop.permute.xlu0 %513  ;;  %v537_v22 = vld [vmem:[#allocation3] sm:$0xff] }
 0x1e5   : > { %533 = vst.msk [vmem:[#allocation3 + $0x20] sm:$0xff] %vm296_vm4, %v514_v21  ;;  %561 = vrot.lane.b32.xlu0 %v537_v22, %s1255_s26  ;;  %v545_v51 = vmax.f32 %v1532_v34, %v537_v22 }
 0x1e7   : > { %v516_v23 = vpop.permute.xlu1 %515  ;;  %v538_v24 = vld [vmem:[#allocation3 + $0x8] sm:$0xff] }
 0x1e8   : > { %534 = vst.msk [vmem:[#allocation3 + $0x28] sm:$0xff] %vm296_vm4, %v516_v23  ;;  %v518_v25 = vpop.permute.xlu0 %517  ;;  %563 = vrot.lane.b32.xlu1 %v538_v24, %s1255_s26  ;;  %v539_v26 = vld [vmem:[#allocation3 + $0x10] sm:$0xff]  ;;  %v546_v55 = vmax.f32 %v1539_v48, %v538_v24 }
 0x1e9   : > { %535 = vst.msk [vmem:[#allocation3 + $0x30] sm:$0xff] %vm296_vm4, %v518_v25  ;;  %565 = vrot.lane.b32.xlu0 %v539_v26, %s1255_s26  ;;  %v547_v44 = vmax.f32 %v1541_v53, %v539_v26 }
 0x1eb   : > { %v520_v27 = vpop.permute.xlu1 %519  ;;  %v540_v28 = vld [vmem:[#allocation3 + $0x18] sm:$0xff] }
 0x1ec   : > { %536 = vst.msk [vmem:[#allocation3 + $0x38] sm:$0xff] %vm296_vm4, %v520_v27  ;;  %567 = vrot.lane.b32.xlu1 %v540_v28, %s1255_s26  ;;  %v541_v29 = vld [vmem:[#allocation3 + $0x20] sm:$0xff]  ;;  %v548_v59 = vmax.f32 %v1547_v62, %v540_v28 }
 0x1ed   : > { %569 = vrot.lane.b32.xlu0 %v541_v29, %s1255_s26  ;;  %v549_v34 = vmax.f32 %v1549_v1, %v541_v29 }
 0x1ef   : > { %v1580_v30 = vld [vmem:[#allocation3 + $0x28] sm:$0xff] }
 0x1f0   : > { %571 = vrot.lane.b32.xlu1 %v1580_v30, %s1255_s26  ;;  %v1584_v31 = vld [vmem:[#allocation3 + $0x30] sm:$0xff]  ;;  %v550_v6 = vmax.f32 %v1555_v12, %v1580_v30 }
 0x1f1   : > { %573 = vrot.lane.b32.xlu0 %v1584_v31, %s1255_s26  ;;  %v551_v62 = vmax.f32 %v1557_v13, %v1584_v31 }
 0x1f3   : > { %v1588_v32 = vld [vmem:[#allocation3 + $0x38] sm:$0xff] }
 0x1f4   : > { %575 = vrot.lane.b32.xlu1 %v1588_v32, %s1255_s26  ;;  %v552_v16 = vmax.f32 %v1563_v17, %v1588_v32 }
 0x1f5   : > { %593 = vrot.lane.b32.xlu0 %v537_v22, %s1256_s27 }
 0x1f8   : > { %595 = vrot.lane.b32.xlu1 %v538_v24, %s1256_s27 }
 0x1f9   : > { %597 = vrot.lane.b32.xlu0 %v539_v26, %s1256_s27 }
 0x1fc   : > { %599 = vrot.lane.b32.xlu1 %v540_v28, %s1256_s27 }
 0x1fd   : > { %601 = vrot.lane.b32.xlu0 %v541_v29, %s1256_s27 }
 0x200   : > { %603 = vrot.lane.b32.xlu1 %v1580_v30, %s1256_s27 }
 0x201   : > { %605 = vrot.lane.b32.xlu0 %v1584_v31, %s1256_s27 }
 0x204   : > { %607 = vrot.lane.b32.xlu1 %v1588_v32, %s1256_s27 }
 0x205   : > { %625 = vrot.lane.b32.xlu0 %v537_v22, %s1257_s28 }
 0x208   : > { %627 = vrot.lane.b32.xlu1 %v538_v24, %s1257_s28 }
 0x209   : > { %629 = vrot.lane.b32.xlu0 %v539_v26, %s1257_s28 }
 0x20c   : > { %631 = vrot.lane.b32.xlu1 %v540_v28, %s1257_s28 }
 0x20d   : > { %633 = vrot.lane.b32.xlu0 %v541_v29, %s1257_s28 }
 0x210   : > { %635 = vrot.lane.b32.xlu1 %v1580_v30, %s1257_s28 }
 0x211   : > { %637 = vrot.lane.b32.xlu0 %v1584_v31, %s1257_s28 }
 0x214   : > { %639 = vrot.lane.b32.xlu1 %v1588_v32, %s1257_s28 }
 0x257   : > { %v562_v33 = vpop.permute.xlu0 %561 }
 0x258   : > { %v585_v37 = vmax.f32 %v545_v51, %v562_v33 }
 0x25a   : > { %v564_v35 = vpop.permute.xlu1 %563 }
 0x25b   : > { %v566_v36 = vpop.permute.xlu0 %565  ;;  %v586_v57 = vmax.f32 %v546_v55, %v564_v35 }
 0x25c   : > { %v587_v60 = vmax.f32 %v547_v44, %v566_v36 }
 0x25e   : > { %v568_v38 = vpop.permute.xlu1 %567 }
 0x25f   : > { %v570_v39 = vpop.permute.xlu0 %569  ;;  %v588_v53 = vmax.f32 %v548_v59, %v568_v38 }
 0x260   : > { %v589_v3 = vmax.f32 %v549_v34, %v570_v39 }
 0x262   : > { %v572_v40 = vpop.permute.xlu1 %571 }
 0x263   : > { %v574_v41 = vpop.permute.xlu0 %573  ;;  %v590_v10 = vmax.f32 %v550_v6, %v572_v40 }
 0x264   : > { %v591_v12 = vmax.f32 %v551_v62, %v574_v41 }
 0x266   : > { %v576_v42 = vpop.permute.xlu1 %575 }
 0x267   : > { %v594_v43 = vpop.permute.xlu0 %593  ;;  %v592_v21 = vmax.f32 %v552_v16, %v576_v42 }
 0x268   : > { %v617_v49 = vmax.f32 %v585_v37, %v594_v43 }
 0x26a   : > { %v596_v45 = vpop.permute.xlu1 %595 }
 0x26b   : > { %v598_v46 = vpop.permute.xlu0 %597  ;;  %v618_v63 = vmax.f32 %v586_v57, %v596_v45 }
 0x26c   : > { %v619_v0 = vmax.f32 %v587_v60, %v598_v46 }
 0x26e   : > { %v600_v47 = vpop.permute.xlu1 %599 }
 0x26f   : > { %v602_v50 = vpop.permute.xlu0 %601  ;;  %v620_v7 = vmax.f32 %v588_v53, %v600_v47 }
 0x270   : > { %v621_v1 = vmax.f32 %v589_v3, %v602_v50 }
 0x272   : > { %v604_v52 = vpop.permute.xlu1 %603 }
 0x273   : > { %v606_v54 = vpop.permute.xlu0 %605  ;;  %v622_v8 = vmax.f32 %v590_v10, %v604_v52 }
 0x274   : > { %v623_v13 = vmax.f32 %v591_v12, %v606_v54 }
 0x276   : > { %v1617_v56 = vpop.permute.xlu1 %607 }
 0x277   : > { %v626_v58 = vpop.permute.xlu0 %625  ;;  %v624_v28 = vmax.f32 %v592_v21, %v1617_v56 }
 0x278   : > { %v649_v61 = vmax.f32 %v617_v49, %v626_v58 }
 0x27a   : > { %657 = vst.msk [vmem:[#allocation2 + $0x2] sm:$0xff] %vm191_vm3, %v649_v61  ;;  %1046 = vst.msk [vmem:[%s1379_s24 + $0x80] sm:$0xff] %vm191_vm3, %v649_v61  ;;  %v628_v48 = vpop.permute.xlu1 %627 }
 0x27b   : > { %v650_v2 = vmax.f32 %v618_v63, %v628_v48  ;;  %v630_v4 = vpop.permute.xlu0 %629 }
 0x27c   : > { %v651_v5 = vmax.f32 %v619_v0, %v630_v4 }
 0x27d   : > { %658 = vst.msk [vmem:[#allocation2 + $0xa] sm:$0xff] %vm191_vm3, %v650_v2  ;;  %1047 = vst.msk [vmem:[%s1379_s24 + $0x88] sm:$0xff] %vm191_vm3, %v650_v2 }
 0x27e   : > { %659 = vst.msk [vmem:[#allocation2 + $0x1a] sm:$0xff] %vm191_vm3, %v651_v5  ;;  %1048 = vst.msk [vmem:[%s1379_s24 + $0x90] sm:$0xff] %vm191_vm3, %v651_v5  ;;  %v632_v9 = vpop.permute.xlu1 %631 }
 0x27f   : > { %v652_v11 = vmax.f32 %v620_v7, %v632_v9  ;;  %v634_v14 = vpop.permute.xlu0 %633 }
 0x280   : > { %v653_v15 = vmax.f32 %v621_v1, %v634_v14 }
 0x281   : > { %v665_v18 = vld [vmem:[#allocation2] sm:$0xff]  ;;  %660 = vst.msk [vmem:[#allocation2 + $0x22] sm:$0xff] %vm191_vm3, %v652_v11  ;;  %1049 = vst.msk [vmem:[%s1379_s24 + $0x98] sm:$0xff] %vm191_vm3, %v652_v11 }
 0x282   : > { %v673_v19 = vmax.f32 %v649_v61, %v665_v18  ;;  %661 = vst.msk [vmem:[#allocation2 + $0x32] sm:$0xff] %vm191_vm3, %v653_v15  ;;  %1050 = vst.msk [vmem:[%s1379_s24 + $0xa0] sm:$0xff] %vm191_vm3, %v653_v15  ;;  %v636_v20 = vpop.permute.xlu1 %635  ;;  %v681_v22 = vld [vmem:[#allocation2 + $0x1] sm:$0xff] }
 0x283   : > { %v654_v23 = vmax.f32 %v622_v8, %v636_v20  ;;  %v638_v24 = vpop.permute.xlu0 %637 }
 0x284   : > { %v689_v17 = vmax.f32 %v673_v19, %v681_v22  ;;  %v666_v25 = vld [vmem:[#allocation2 + $0x8] sm:$0xff]  ;;  %v655_v26 = vmax.f32 %v623_v13, %v638_v24 }
 0x285   : > { %v697_v27 = vld [vmem:[#allocation2 + $0x3] sm:$0xff]  ;;  %v674_v29 = vmax.f32 %v650_v2, %v666_v25  ;;  %v667_v30 = vld [vmem:[#allocation2 + $0x18] sm:$0xff]  ;;  %662 = vst.msk [vmem:[#allocation2 + $0x3a] sm:$0xff] %vm191_vm3, %v654_v23  ;;  %1051 = vst.msk [vmem:[%s1379_s24 + $0xa8] sm:$0xff] %vm191_vm3, %v654_v23 }
 0x286   : > { %v682_v31 = vld [vmem:[#allocation2 + $0x9] sm:$0xff]  ;;  %v675_v32 = vmax.f32 %v651_v5, %v667_v30  ;;  %663 = vst.msk [vmem:[#allocation2 + $0x4a] sm:$0xff] %vm191_vm3, %v655_v26  ;;  %1052 = vst.msk [vmem:[%s1379_s24 + $0xb0] sm:$0xff] %vm191_vm3, %v655_v26  ;;  %v640_v33 = vpop.permute.xlu1 %639  ;;  %v705_v35 = vmax.f32 %v689_v17, %v697_v27  ;;  %v683_v38 = vld [vmem:[#allocation2 + $0x19] sm:$0xff] }
 0x287   : > { %v690_v36 = vmax.f32 %v674_v29, %v682_v31  ;;  %v656_v39 = vmax.f32 %v624_v28, %v640_v33  ;;  %v713_v40 = vld [vmem:[#allocation2 + $0x4] sm:$0xff]  ;;  %v714_v37 = vld [vmem:[#allocation2 + $0xc] sm:$0xff] }
 0x288   : > { %v691_v41 = vmax.f32 %v675_v32, %v683_v38  ;;  %v668_v42 = vld [vmem:[#allocation2 + $0x20] sm:$0xff]  ;;  %v1649_v43 = vmax.f32 %v705_v35, %v713_v40  ;;  %v698_v45 = vld [vmem:[#allocation2 + $0xb] sm:$0xff] }
 0x289   : > { %v699_v46 = vld [vmem:[#allocation2 + $0x1b] sm:$0xff]  ;;  %v676_v47 = vmax.f32 %v652_v11, %v668_v42  ;;  %v669_v50 = vld [vmem:[#allocation2 + $0x30] sm:$0xff]  ;;  %664 = vst.msk [vmem:[#allocation2 + $0x52] sm:$0xff] %vm191_vm3, %v656_v39  ;;  %1053 = vst.msk [vmem:[%s1379_s24 + $0xb8] sm:$0xff] %vm191_vm3, %v656_v39  ;;  %v706_v51 = vmax.f32 %v690_v36, %v698_v45 }
 0x28a   : > { %v684_v52 = vld [vmem:[#allocation2 + $0x21] sm:$0xff]  ;;  %v677_v54 = vmax.f32 %v653_v15, %v669_v50  ;;  %737 = vrot.lane.b32.xlu0 %v1649_v43, %s1254_s25  ;;  %v707_v55 = vmax.f32 %v691_v41, %v699_v46  ;;  %v685_v49 = vld [vmem:[#allocation2 + $0x31] sm:$0xff] }
 0x28b   : > { %v692_v44 = vmax.f32 %v676_v47, %v684_v52  ;;  %v1656_v56 = vmax.f32 %v706_v51, %v714_v37  ;;  %v715_v57 = vld [vmem:[#allocation2 + $0x1c] sm:$0xff]  ;;  %v716_v4 = vld [vmem:[#allocation2 + $0x24] sm:$0xff] }
 0x28c   : > { %v693_v58 = vmax.f32 %v677_v54, %v685_v49  ;;  %v670_v60 = vld [vmem:[#allocation2 + $0x38] sm:$0xff]  ;;  %v1658_v61 = vmax.f32 %v707_v55, %v715_v57  ;;  %v700_v59 = vld [vmem:[#allocation2 + $0x23] sm:$0xff] }
 0x28d   : > { %v701_v63 = vld [vmem:[#allocation2 + $0x33] sm:$0xff]  ;;  %v678_v34 = vmax.f32 %v654_v23, %v670_v60  ;;  %v671_v0 = vld [vmem:[#allocation2 + $0x48] sm:$0xff]  ;;  %739 = vrot.lane.b32.xlu1 %v1656_v56, %s1254_s25  ;;  %v708_v48 = vmax.f32 %v692_v44, %v700_v59  ;;  %v702_v11 = vld [vmem:[#allocation2 + $0x3b] sm:$0xff] }
 0x28e   : > { %v686_v53 = vld [vmem:[#allocation2 + $0x39] sm:$0xff]  ;;  %v679_v2 = vmax.f32 %v655_v26, %v671_v0  ;;  %741 = vrot.lane.b32.xlu0 %v1658_v61, %s1254_s25  ;;  %v709_v3 = vmax.f32 %v693_v58, %v701_v63  ;;  %v687_v6 = vld [vmem:[#allocation2 + $0x49] sm:$0xff] }
 0x28f   : > { %v694_v5 = vmax.f32 %v678_v34, %v686_v53  ;;  %v1664_v7 = vmax.f32 %v708_v48, %v716_v4  ;;  %v717_v62 = vld [vmem:[#allocation2 + $0x34] sm:$0xff]  ;;  %v718_v8 = vld [vmem:[#allocation2 + $0x3c] sm:$0xff] }
 0x290   : > { %v695_v1 = vmax.f32 %v679_v2, %v687_v6  ;;  %v672_v9 = vld [vmem:[#allocation2 + $0x50] sm:$0xff]  ;;  %v1666_v10 = vmax.f32 %v709_v3, %v717_v62 }
 0x291   : > { %v703_v14 = vld [vmem:[#allocation2 + $0x4b] sm:$0xff]  ;;  %v680_v12 = vmax.f32 %v656_v39, %v672_v9  ;;  %743 = vrot.lane.b32.xlu1 %v1664_v7, %s1254_s25  ;;  %v710_v15 = vmax.f32 %v694_v5, %v702_v11  ;;  %v704_v22 = vld [vmem:[#allocation2 + $0x53] sm:$0xff] }
 0x292   : > { %v688_v16 = vld [vmem:[#allocation2 + $0x51] sm:$0xff]  ;;  %745 = vrot.lane.b32.xlu0 %v1666_v10, %s1254_s25  ;;  %v711_v18 = vmax.f32 %v695_v1, %v703_v14 }
 0x293   : > { %v696_v13 = vmax.f32 %v680_v12, %v688_v16  ;;  %v1672_v19 = vmax.f32 %v710_v15, %v718_v8  ;;  %v719_v20 = vld [vmem:[#allocation2 + $0x4c] sm:$0xff]  ;;  %v720_v24 = vld [vmem:[#allocation2 + $0x54] sm:$0xff] }
 0x294   : > { %v1674_v21 = vmax.f32 %v711_v18, %v719_v20 }
 0x295   : > { %747 = vrot.lane.b32.xlu1 %v1672_v19, %s1254_s25  ;;  %v712_v23 = vmax.f32 %v696_v13, %v704_v22 }
 0x296   : > { %749 = vrot.lane.b32.xlu0 %v1674_v21, %s1254_s25 }
 0x297   : > { %v1680_v17 = vmax.f32 %v712_v23, %v720_v24 }
 0x299   : > { %751 = vrot.lane.b32.xlu1 %v1680_v17, %s1254_s25 }
 0x2fc   : > { %v738_v25 = vpop.permute.xlu0 %737 }
 0x2fd   : > { %761 = vst.msk [vmem:[#allocation3] sm:$0xff] %vm296_vm4, %v738_v25 }
 0x2ff   : > { %v740_v26 = vpop.permute.xlu1 %739 }
 0x300   : > { %762 = vst.msk [vmem:[#allocation3 + $0x8] sm:$0xff] %vm296_vm4, %v740_v26  ;;  %v742_v27 = vpop.permute.xlu0 %741 }
 0x301   : > { %763 = vst.msk [vmem:[#allocation3 + $0x10] sm:$0xff] %vm296_vm4, %v742_v27 }
 0x303   : > { %v744_v28 = vpop.permute.xlu1 %743 }
 0x304   : > { %764 = vst.msk [vmem:[#allocation3 + $0x18] sm:$0xff] %vm296_vm4, %v744_v28  ;;  %v746_v29 = vpop.permute.xlu0 %745  ;;  %v769_v30 = vld [vmem:[#allocation3] sm:$0xff] }
 0x305   : > { %765 = vst.msk [vmem:[#allocation3 + $0x20] sm:$0xff] %vm296_vm4, %v746_v29  ;;  %793 = vrot.lane.b32.xlu0 %v769_v30, %s1255_s26  ;;  %v777_v60 = vmax.f32 %v1649_v43, %v769_v30 }
 0x307   : > { %v748_v31 = vpop.permute.xlu1 %747  ;;  %v770_v32 = vld [vmem:[#allocation3 + $0x8] sm:$0xff] }
 0x308   : > { %766 = vst.msk [vmem:[#allocation3 + $0x28] sm:$0xff] %vm296_vm4, %v748_v31  ;;  %v750_v33 = vpop.permute.xlu0 %749  ;;  %795 = vrot.lane.b32.xlu1 %v770_v32, %s1255_s26  ;;  %v771_v35 = vld [vmem:[#allocation3 + $0x10] sm:$0xff]  ;;  %v778_v0 = vmax.f32 %v1656_v56, %v770_v32 }
 0x309   : > { %767 = vst.msk [vmem:[#allocation3 + $0x30] sm:$0xff] %vm296_vm4, %v750_v33  ;;  %797 = vrot.lane.b32.xlu0 %v771_v35, %s1255_s26  ;;  %v779_v48 = vmax.f32 %v1658_v61, %v771_v35 }
 0x30b   : > { %v752_v36 = vpop.permute.xlu1 %751  ;;  %v772_v38 = vld [vmem:[#allocation3 + $0x18] sm:$0xff] }
 0x30c   : > { %768 = vst.msk [vmem:[#allocation3 + $0x38] sm:$0xff] %vm296_vm4, %v752_v36  ;;  %799 = vrot.lane.b32.xlu1 %v772_v38, %s1255_s26  ;;  %v773_v39 = vld [vmem:[#allocation3 + $0x20] sm:$0xff]  ;;  %v780_v62 = vmax.f32 %v1664_v7, %v772_v38 }
 0x30d   : > { %801 = vrot.lane.b32.xlu0 %v773_v39, %s1255_s26  ;;  %v781_v43 = vmax.f32 %v1666_v10, %v773_v39 }
 0x30f   : > { %v1697_v40 = vld [vmem:[#allocation3 + $0x28] sm:$0xff] }
 0x310   : > { %803 = vrot.lane.b32.xlu1 %v1697_v40, %s1255_s26  ;;  %v1701_v41 = vld [vmem:[#allocation3 + $0x30] sm:$0xff]  ;;  %v782_v16 = vmax.f32 %v1672_v19, %v1697_v40 }
 0x311   : > { %805 = vrot.lane.b32.xlu0 %v1701_v41, %s1255_s26  ;;  %v783_v7 = vmax.f32 %v1674_v21, %v1701_v41 }
 0x313   : > { %v1705_v42 = vld [vmem:[#allocation3 + $0x38] sm:$0xff] }
 0x314   : > { %807 = vrot.lane.b32.xlu1 %v1705_v42, %s1255_s26  ;;  %v784_v24 = vmax.f32 %v1680_v17, %v1705_v42 }
 0x315   : > { %825 = vrot.lane.b32.xlu0 %v769_v30, %s1256_s27 }
 0x318   : > { %827 = vrot.lane.b32.xlu1 %v770_v32, %s1256_s27 }
 0x319   : > { %829 = vrot.lane.b32.xlu0 %v771_v35, %s1256_s27 }
 0x31c   : > { %831 = vrot.lane.b32.xlu1 %v772_v38, %s1256_s27 }
 0x31d   : > { %833 = vrot.lane.b32.xlu0 %v773_v39, %s1256_s27 }
 0x320   : > { %835 = vrot.lane.b32.xlu1 %v1697_v40, %s1256_s27 }
 0x321   : > { %837 = vrot.lane.b32.xlu0 %v1701_v41, %s1256_s27 }
 0x324   : > { %839 = vrot.lane.b32.xlu1 %v1705_v42, %s1256_s27 }
 0x325   : > { %857 = vrot.lane.b32.xlu0 %v769_v30, %s1257_s28 }
 0x328   : > { %859 = vrot.lane.b32.xlu1 %v770_v32, %s1257_s28 }
 0x329   : > { %861 = vrot.lane.b32.xlu0 %v771_v35, %s1257_s28 }
 0x32c   : > { %863 = vrot.lane.b32.xlu1 %v772_v38, %s1257_s28 }
 0x32d   : > { %865 = vrot.lane.b32.xlu0 %v773_v39, %s1257_s28 }
 0x330   : > { %867 = vrot.lane.b32.xlu1 %v1697_v40, %s1257_s28 }
 0x331   : > { %869 = vrot.lane.b32.xlu0 %v1701_v41, %s1257_s28 }
 0x334   : > { %871 = vrot.lane.b32.xlu1 %v1705_v42, %s1257_s28 }
 0x377   : > { %v794_v45 = vpop.permute.xlu0 %793 }
 0x378   : > { %v817_v34 = vmax.f32 %v777_v60, %v794_v45 }
 0x37a   : > { %v796_v46 = vpop.permute.xlu1 %795 }
 0x37b   : > { %v798_v47 = vpop.permute.xlu0 %797  ;;  %v818_v4 = vmax.f32 %v778_v0, %v796_v46 }
 0x37c   : > { %v819_v5 = vmax.f32 %v779_v48, %v798_v47 }
 0x37e   : > { %v800_v50 = vpop.permute.xlu1 %799 }
 0x37f   : > { %v802_v51 = vpop.permute.xlu0 %801  ;;  %v820_v56 = vmax.f32 %v780_v62, %v800_v50 }
 0x380   : > { %v821_v12 = vmax.f32 %v781_v43, %v802_v51 }
 0x382   : > { %v804_v52 = vpop.permute.xlu1 %803 }
 0x383   : > { %v806_v54 = vpop.permute.xlu0 %805  ;;  %v822_v13 = vmax.f32 %v782_v16, %v804_v52 }
 0x384   : > { %v823_v23 = vmax.f32 %v783_v7, %v806_v54 }
 0x386   : > { %v808_v37 = vpop.permute.xlu1 %807 }
 0x387   : > { %v826_v55 = vpop.permute.xlu0 %825  ;;  %v824_v27 = vmax.f32 %v784_v24, %v808_v37 }
 0x388   : > { %v849_v53 = vmax.f32 %v817_v34, %v826_v55 }
 0x38a   : > { %v828_v44 = vpop.permute.xlu1 %827 }
 0x38b   : > { %v830_v49 = vpop.permute.xlu0 %829  ;;  %v850_v1 = vmax.f32 %v818_v4, %v828_v44 }
 0x38c   : > { %v851_v9 = vmax.f32 %v819_v5, %v830_v49 }
 0x38e   : > { %v832_v57 = vpop.permute.xlu1 %831 }
 0x38f   : > { %v834_v58 = vpop.permute.xlu0 %833  ;;  %v852_v8 = vmax.f32 %v820_v56, %v832_v57 }
 0x390   : > { %v853_v10 = vmax.f32 %v821_v12, %v834_v58 }
 0x392   : > { %v836_v59 = vpop.permute.xlu1 %835 }
 0x393   : > { %v838_v63 = vpop.permute.xlu0 %837  ;;  %v854_v25 = vmax.f32 %v822_v13, %v836_v59 }
 0x394   : > { %v855_v21 = vmax.f32 %v823_v23, %v838_v63 }
 0x396   : > { %v840_v2 = vpop.permute.xlu1 %839 }
 0x397   : > { %v858_v3 = vpop.permute.xlu0 %857  ;;  %v856_v31 = vmax.f32 %v824_v27, %v840_v2 }
 0x398   : > { %v881_v6 = vmax.f32 %v849_v53, %v858_v3 }
 0x39a   : > { %1054 = vst.msk [vmem:[%s1379_s24 + $0xc0] sm:$0xff] %vm191_vm3, %v881_v6  ;;  %v860_v11 = vpop.permute.xlu1 %859 }
 0x39b   : > { %v882_v14 = vmax.f32 %v850_v1, %v860_v11  ;;  %v862_v61 = vpop.permute.xlu0 %861 }
 0x39c   : > { %v883_v15 = vmax.f32 %v851_v9, %v862_v61 }
 0x39d   : > { %1055 = vst.msk [vmem:[%s1379_s24 + $0xc8] sm:$0xff] %vm191_vm3, %v882_v14 }
 0x39e   : > { %1056 = vst.msk [vmem:[%s1379_s24 + $0xd0] sm:$0xff] %vm191_vm3, %v883_v15  ;;  %v864_v18 = vpop.permute.xlu1 %863 }
 0x39f   : > { %v884_v20 = vmax.f32 %v852_v8, %v864_v18  ;;  %v866_v22 = vpop.permute.xlu0 %865 }
 0x3a0   : > { %v885_v19 = vmax.f32 %v853_v10, %v866_v22 }
 0x3a1   : > { %1057 = vst.msk [vmem:[%s1379_s24 + $0xd8] sm:$0xff] %vm191_vm3, %v884_v20 }
 0x3a2   : > { %1058 = vst.msk [vmem:[%s1379_s24 + $0xe0] sm:$0xff] %vm191_vm3, %v885_v19  ;;  %v868_v26 = vpop.permute.xlu1 %867 }
 0x3a3   : > { %v886_v28 = vmax.f32 %v854_v25, %v868_v26  ;;  %v870_v29 = vpop.permute.xlu0 %869 }
 0x3a4   : > { %v887_v30 = vmax.f32 %v855_v21, %v870_v29 }
 0x3a5   : > { %1059 = vst.msk [vmem:[%s1379_s24 + $0xe8] sm:$0xff] %vm191_vm3, %v886_v28 }
 0x3a6   : > { %1060 = vst.msk [vmem:[%s1379_s24 + $0xf0] sm:$0xff] %vm191_vm3, %v887_v30  ;;  %v872_v17 = vpop.permute.xlu1 %871 }
 0x3a7   : > { %v888_v32 = vmax.f32 %v856_v31, %v872_v17 }
 0x3a9   : > { %1061 = vst.msk [vmem:[%s1379_s24 + $0xf8] sm:$0xff] %vm191_vm3, %v888_v32 }
 0x3aa   : > { %1181 = shalt.err (!%p1178_p6)
}
 0x3ab   : > { %s1182_s17 = scalar_lea.hbm %s1761_s4, 4096  ;;  %s1186_s18 = scalar_lea.hbm %s1814_s1, 8192 }
 0x3ac   : > { %p1183_p7 = scmp.ne.s32.totalorder %s1761_s4, %s1182_s17  ;;  %p1187_p13 = scmp.lt.s32.totalorder %s1761_s4, %s1814_s1 }
 0x3ad   : > { %p1188_p2 = scmp.lt.s32.totalorder %s1186_s18, %s1182_s17 }
 0x3ae   : > { %p1184_p10 = pnand %p1183_p7, %p1322_p9 }
 0x3af   : > { %p1189_p8 = por %p1188_p2, %p1187_p13 }
 0x3b0   : > { %p1185_p4 = pneg %p1184_p10 }
 0x3b2   : > { %p1190_p12 = pnand %p1189_p8, %p1185_p4 }
 0x3b4   : > { %1193 = shalt.err (!%p1190_p12)
}
 0x3b5   : > { %s1259_s26 = smov 128   ;;  %s1260_s27 = smov 8  }
 0x3b6   : > { %1071 = dma.vmem_to_hbm [thread:$0]  (%p1322_p9), %s1763_s30, 4096, %s1761_s4, %s925_s9, %s1259_s26, %s1259_s26, %s1260_s27  }
 0x3b7 PF: > { %s956_s28 = sand.u32 1, %s1228_s6   ;;  %p1820_p0 = scmp.ge.s32.totalorder %s1248_s11, 2 }
 0x3b8   : > { %s957_s29 = scalar_lea.sflag [#allocation6], %s956_s28 }
 0x3b9   : > { %p1078_p1 = pnand %p1820_p0, %p1329_p11 }
 0x3bb   : > { %p1079_p3 = pneg %p1078_p1 }
 0x3bd   : > { %1223 = dma.done.wait (%p1079_p3), %s957_s29, 4096  }
 0x3be   : > { %1225 = vsyncadd (%p1079_p3), %s957_s29, 4294963200  ;;  %s17_s11 = sadd.s32 1, %s1248_s11   ;;  %s1821_s6 = smov %s1232_s7 }
 0x3bf   : > { %p14_p5 = scmp.ge.s32.totalorder %s17_s11, 4   ;;  %s1822_s7 = smov %s1236_s8 }
 0x3c0   : > { %s1823_s8 = smov %s1327_s20  ;;  %s1824_s9 = smov %s1244_s10 }
 0x3c1   : > { %s1825_s10 = smov %s1827_s14  ;;  %16 = sbr.rel (!%p14_p5) target bundleno = 6 (0x6), region = 72 }
 0x3c6   :  { %962 = vsyncpa [#allocation5], 1 }
 0x3c7   :  { %964 = vsyncpa [#allocation5 + $0x1], 1 }
 0x3c8   :  { %965 = vsyncpa [#allocation6], 1 }
 0x3c9   :  { %967 = vsyncpa [#allocation6 + $0x1], 1 }

</bundles_post_ra>
